<compile_context>
chip_gen: v7x
topology: tpu7x:2x2x1
jax: 0.10.0
libtpu: 0.0.40
codegen_flags: <defaults>
</compile_context>

<pallas_src>
import functools

import jax
import jax.numpy as jnp
from jax.experimental import pallas as pl
from jax.experimental.pallas import tpu as pltpu


_LANE_CHOICES = (512, 256, 128)        # lane-dense first; all multiples of 128
_TARGET_TILE_BYTES = 4 * 1024 * 1024   # ~4 MiB per input stream tile
_ACC_MAX_ROWS = 512                    # accumulator fixed at <= (512, L) f32
_VMEM_LIMIT_BYTES = 32 * 1024 * 1024   # explicit scoped-VMEM limit (safe on all gens)


def _default_num_parts():
    """2 only on dual-TensorCore v7x; v5e/v6e are single-TC -> 1."""
    try:
        kind = jax.devices()[0].device_kind.lower()
    except Exception:
        return 1
    return 2 if "v7" in kind else 1


def _vae_loss_kernel(x_ref, t_ref, recon_ref, acc_ref, *, loss_type,
                     tile_rows, acc_rows, tiles_per_part, total_rows,
                     need_mask):
    p = pl.program_id(0)                      # part axis (megacore split on v7x)
    i = pl.program_id(1)                      # streaming reduction axis

    @pl.when(i == 0)
    def _init():
        acc_ref[...] = jnp.zeros_like(acc_ref)

    # Un-clamped global start row of this block; used for masking ragged /
    # duplicate boundary blocks (the index_map clamps the DMA separately).
    row0 = (p * tiles_per_part + i) * tile_rows

    n_chunks = -(-tile_rows // acc_rows)
    for c in range(n_chunks):                 # static unroll
        r0 = c * acc_rows
        rs = min(acc_rows, tile_rows - r0)    # static chunk size
        x = x_ref[pl.ds(r0, rs), :].astype(jnp.float32)
        t = t_ref[pl.ds(r0, rs), :].astype(jnp.float32)
        if loss_type == "mse":
            d = x - t
            contrib = d * d
        else:  # 'bce' — matches F.binary_cross_entropy's log clamp at -100.
            log_x = jnp.maximum(jnp.log(x), -100.0)
            log_1mx = jnp.maximum(jnp.log1p(-x), -100.0)
            contrib = -(t * log_x + (1.0 - t) * log_1mx)
        if need_mask:
            row = (row0 + r0
                   + jax.lax.broadcasted_iota(jnp.int32, (rs, 1), 0))
            contrib = jnp.where(row < total_rows, contrib, 0.0)
        acc_ref[pl.ds(0, rs), :] += contrib

    @pl.when(i == pl.num_programs(1) - 1)
    def _finalize():
        # Single cross-lane/XLU reduce per part, written once, in finalize.
        recon_ref[0, 0] = jnp.sum(acc_ref[...])


def vae_loss(input_, target, mean, log_var, *, reduction="sum",
             reconstruction_loss_type="mse", max_tile_rows=None,
             num_parts=None):
    loss_type = reconstruction_loss_type.lower()
    assert loss_type in {"mse", "bce", "binary_cross_entropy"}
    loss_type = "mse" if loss_type == "mse" else "bce"
    assert reduction in {"sum", "mean"}

    n_elems = int(input_.size)
    n_batch = mean.shape[0]

    def per_elem(x, t):
        x = x.astype(jnp.float32)
        t = t.astype(jnp.float32)
        if loss_type == "mse":
            d = x - t
            return d * d
        log_x = jnp.maximum(jnp.log(x), -100.0)
        log_1mx = jnp.maximum(jnp.log1p(-x), -100.0)
        return -(t * log_x + (1.0 - t) * log_1mx)

    # ---- copy-free 2-D layout ----------------------------------------------
    # Prefer the largest lane width that divides n_elems AND gives >= 8 rows;
    # fall back to any divisor; otherwise peel a (<128)-element tail.
    lanes = None
    for cand in _LANE_CHOICES:
        if n_elems % cand == 0 and n_elems // cand >= 8:
            lanes = cand
            break
    if lanes is None:
        for cand in _LANE_CHOICES:
            if n_elems % cand == 0:
                lanes = cand
                break
    if lanes is None:
        lanes = _LANE_CHOICES[-1]

    rem = n_elems % lanes
    n_main = n_elems - rem
    rows = n_main // lanes

    flat_x = input_.reshape(-1)
    flat_t = target.reshape(-1)
    if rem:
        # Tail (< 128 elements) handled with plain jnp.  Note: the prefix
        # slice below may materialize one copy; a fully zero-copy ragged tail
        # would need a manual-DMA (pl.ANY) variant.
        # TODO(synk): zero-copy ragged tail via manual DMA if this case matters.
        tail = jnp.sum(per_elem(flat_x[n_main:], flat_t[n_main:]))
        x2 = flat_x[:n_main].reshape(rows, lanes) if rows else None
        t2 = flat_t[:n_main].reshape(rows, lanes) if rows else None
    else:
        tail = jnp.float32(0.0)
        x2 = flat_x.reshape(rows, lanes)
        t2 = flat_t.reshape(rows, lanes)

    # ---- reconstruction sum (streaming Pallas reduction) ---------------------
    if rows < 8:
        # Tiny input (< ~4K elements): a kernel launch isn't worth it.
        recon_sum = tail
        if rows:
            recon_sum = recon_sum + jnp.sum(per_elem(x2, t2))
    else:
        target_rows = max(8, _TARGET_TILE_BYTES // (lanes * 4))
        if max_tile_rows is not None:
            target_rows = max(1, int(max_tile_rows))
        tr = min(max(8, target_rows), rows)
        tr = max(8, (tr // 8) * 8)                  # multiple of 8, <= rows
        acc_rows = min(tr, _ACC_MAX_ROWS)
        num_tiles = -(-rows // tr)

        parts = _default_num_parts() if num_parts is None else int(num_parts)
        parts = max(1, min(parts, num_tiles))
        tiles_per_part = -(-num_tiles // parts)
        even_split = (parts * tiles_per_part == num_tiles)
        need_mask = (rows % tr != 0) or (not even_split)

        last_block = num_tiles - 1
        if even_split:
            idx_fn = lambda p, i: (p * tiles_per_part + i, 0)
        else:
            # Clamp the DMA to the last valid block; the kernel masks the
            # duplicate block's contribution to zero (no zero-pad tile).
            idx_fn = lambda p, i: (
                jnp.minimum(p * tiles_per_part + i, last_block), 0)

        stream_spec = pl.BlockSpec((tr, lanes), idx_fn)
        out_spec = pl.BlockSpec((1, 1), lambda p, i: (p, 0),
                                memory_space=pltpu.SMEM)

        if loss_type == "mse":
            flops, transcendentals = 3 * n_main, 0
        else:
            flops, transcendentals = 6 * n_main, 2 * n_main
        cost = pl.CostEstimate(flops=flops, transcendentals=transcendentals,
                               bytes_accessed=x2.nbytes + t2.nbytes)

        kernel = functools.partial(
            _vae_loss_kernel, loss_type=loss_type, tile_rows=tr,
            acc_rows=acc_rows, tiles_per_part=tiles_per_part,
            total_rows=rows, need_mask=need_mask)

        recon_parts = pl.pallas_call(
            kernel,
            grid=(parts, tiles_per_part),
            in_specs=[stream_spec, stream_spec],
            out_specs=out_spec,
            out_shape=jax.ShapeDtypeStruct((parts, 1), jnp.float32),
            scratch_shapes=[pltpu.VMEM((acc_rows, lanes), jnp.float32)],
            compiler_params=pltpu.CompilerParams(
                dimension_semantics=("parallel", "arbitrary"),
                vmem_limit_bytes=_VMEM_LIMIT_BYTES),
            cost_estimate=cost,
        )(x2, t2)
        recon_sum = jnp.sum(recon_parts) + tail

    # ---- KL term: tiny (B, D); plain jnp in the wrapper ----------------------
    mu = mean.astype(jnp.float32)
    lv = log_var.astype(jnp.float32)
    kl = 0.5 * jnp.sum(mu * mu + jnp.exp(lv) - lv - 1.0, axis=1)
    kl = jnp.mean(kl) if reduction == "mean" else jnp.sum(kl)

    if reduction == "mean":
        recon_sum = recon_sum / n_elems   # F.mse_loss / F.bce 'mean' semantics
    return recon_sum + kl


def _vae_loss_ref(input_, target, mean, log_var, *, reduction="sum",
                  reconstruction_loss_type="mse"):
    x = input_.astype(jnp.float32)
    t = target.astype(jnp.float32)
    if reconstruction_loss_type == "mse":
        per_elem = (x - t) ** 2
    else:
        log_x = jnp.maximum(jnp.log(x), -100.0)
        log_1mx = jnp.maximum(jnp.log1p(-x), -100.0)
        per_elem = -(t * log_x + (1.0 - t) * log_1mx)
    recon = jnp.mean(per_elem) if reduction == "mean" else jnp.sum(per_elem)
    kl = 0.5 * jnp.sum(mean * mean + jnp.exp(log_var) - log_var - 1.0, axis=1)
    kl = jnp.mean(kl) if reduction == "mean" else jnp.sum(kl)
    return recon + kl


if __name__ == "__main__":
    key = jax.random.PRNGKey(0)
    k1, k2, k3, k4, k5, k6 = jax.random.split(key, 6)
    D = 32

    # --- Test 1: default module config ('sum', 'mse'), small aligned shape. --
    B, C, H, W = 2, 4, 16, 16
    x1 = jax.random.normal(k1, (B, C, H, W), dtype=jnp.float32)
    t1 = jax.random.normal(k2, (B, C, H, W), dtype=jnp.float32)
    mu1 = jax.random.normal(k3, (B, D), dtype=jnp.float32)
    lv1 = jax.random.normal(k4, (B, D), dtype=jnp.float32) * 0.1
    out = jax.block_until_ready(
        vae_loss(x1, t1, mu1, lv1, reduction="sum",
                 reconstruction_loss_type="mse"))
    ref = _vae_loss_ref(x1, t1, mu1, lv1, reduction="sum",
                        reconstruction_loss_type="mse")
    assert jnp.allclose(out, ref, rtol=1e-5, atol=1e-5), (out, ref)

    # --- Test 2: multi-tile, even 2-part split, BCE + 'mean'. -----------------
    B2, C2, H2, W2 = 4, 8, 32, 32
    xb = jax.nn.sigmoid(jax.random.normal(k5, (B2, C2, H2, W2), jnp.float32))
    tb = jax.nn.sigmoid(jax.random.normal(k6, (B2, C2, H2, W2), jnp.float32))
    mu2 = jax.random.normal(k3, (B2, D), dtype=jnp.float32)
    lv2 = jax.random.normal(k4, (B2, D), dtype=jnp.float32) * 0.1
    out2 = jax.block_until_ready(
        vae_loss(xb, tb, mu2, lv2, reduction="mean",
                 reconstruction_loss_type="bce", max_tile_rows=8,
                 num_parts=2))
    ref2 = _vae_loss_ref(xb, tb, mu2, lv2, reduction="mean",
                         reconstruction_loss_type="bce")
    assert jnp.allclose(out2, ref2, rtol=1e-4, atol=1e-3), (out2, ref2)

    # --- Test 3: odd tile count + uneven 2-part split + partial last tile
    #     (exercises the clamped index_map and in-kernel row masking), BCE 'sum'.
    B3, C3, H3, W3 = 5, 8, 16, 32          # 20480 elems -> 40 rows @ 512 lanes
    xc = jax.nn.sigmoid(jax.random.normal(k1, (B3, C3, H3, W3), jnp.float32))
    tc = jax.nn.sigmoid(jax.random.normal(k2, (B3, C3, H3, W3), jnp.float32))
    mu3 = jax.random.normal(k3, (B3, D), dtype=jnp.float32)
    lv3 = jax.random.normal(k4, (B3, D), dtype=jnp.float32) * 0.1
    out3 = jax.block_until_ready(
        vae_loss(xc, tc, mu3, lv3, reduction="sum",
                 reconstruction_loss_type="bce", max_tile_rows=16,
                 num_parts=2))
    ref3 = _vae_loss_ref(xc, tc, mu3, lv3, reduction="sum",
                         reconstruction_loss_type="bce")
    assert jnp.allclose(out3, ref3, rtol=1e-4, atol=1e-2), (out3, ref3)

    # --- Test 4: size not a multiple of 128 (wrapper tail path), MSE 'mean'. --
    B4, C4, H4, W4 = 2, 4, 15, 17           # 2040 elems -> 15 rows @ 128 + tail
    xd = jax.random.normal(k5, (B4, C4, H4, W4), dtype=jnp.float32)
    td = jax.random.normal(k6, (B4, C4, H4, W4), dtype=jnp.float32)
    mu4 = jax.random.normal(k3, (B4, D), dtype=jnp.float32)
    lv4 = jax.random.normal(k4, (B4, D), dtype=jnp.float32) * 0.1
    out4 = jax.block_until_ready(
        vae_loss(xd, td, mu4, lv4, reduction="mean",
                 reconstruction_loss_type="mse"))
    ref4 = _vae_loss_ref(xd, td, mu4, lv4, reduction="mean",
                         reconstruction_loss_type="mse")
    assert jnp.allclose(out4, ref4, rtol=1e-5, atol=1e-4), (out4, ref4)

    print("KERNEL_OK")
</pallas_src>

<mosaic_0001>
module attributes {stable_mosaic.version = 11 : i64} {
  func.func @_vae_loss_kernel(%arg0: i32, %arg1: i32, %arg2: memref<8x256xf32, #tpu.memory_space<vmem>>, %arg3: memref<8x256xf32, #tpu.memory_space<vmem>>, %arg4: memref<1x1xf32, #tpu.memory_space<smem>>, %arg5: memref<8x256xf32, #tpu.memory_space<vmem>>) attributes {dimension_semantics = [#tpu.dimension_semantics<parallel>, #tpu.dimension_semantics<arbitrary>], iteration_bounds = array<i64: 1, 1>, scalar_prefetch = 0 : i64, scratch_operands = 1 : i64, tpu.core_type = #tpu.core_type<tc>, window_params = [{transform_indices = @transform_0, window_bounds = array<i64: 8, 256>}, {transform_indices = @transform_1, window_bounds = array<i64: 8, 256>}, {transform_indices = @transform_2, window_bounds = array<i64: 1, 1>}]} {
    %c0_i32 = arith.constant 0 : i32
    %0 = arith.cmpi eq, %arg1, %c0_i32 : i32
    %1 = arith.extui %0 : i1 to i32
    %c0_i32_0 = arith.constant 0 : i32
    %2 = arith.cmpi ne, %1, %c0_i32_0 : i32
    scf.if %2 {
      %cst = arith.constant 0.000000e+00 : f32
      %13 = vector.broadcast %cst : f32 to vector<8x256xf32>
      %c0_10 = arith.constant 0 : index
      %c0_11 = arith.constant 0 : index
      %14 = vector.load %arg5[%c0_10, %c0_11] : memref<8x256xf32, #tpu.memory_space<vmem>>, vector<8x256xf32>
      tpu.vector_store %arg5[%c0_10, %c0_11], %13 {strides = array<i32>} : memref<8x256xf32, #tpu.memory_space<vmem>>, vector<8x256xf32>,
    } else {
    }
    %c0 = arith.constant 0 : index
    %c0_1 = arith.constant 0 : index
    %3 = vector.load %arg2[%c0, %c0_1] : memref<8x256xf32, #tpu.memory_space<vmem>>, vector<8x256xf32>
    %c0_2 = arith.constant 0 : index
    %c0_3 = arith.constant 0 : index
    %4 = vector.load %arg3[%c0_2, %c0_3] : memref<8x256xf32, #tpu.memory_space<vmem>>, vector<8x256xf32>
    %5 = arith.subf %3, %4 : vector<8x256xf32>
    %6 = arith.mulf %5, %5 : vector<8x256xf32>
    %c0_4 = arith.constant 0 : index
    %c0_5 = arith.constant 0 : index
    %7 = vector.load %arg5[%c0_4, %c0_5] : memref<8x256xf32, #tpu.memory_space<vmem>>, vector<8x256xf32>
    %8 = arith.addf %7, %6 : vector<8x256xf32>
    %c0_6 = arith.constant 0 : index
    %c0_7 = arith.constant 0 : index
    %9 = vector.load %arg5[%c0_6, %c0_7] : memref<8x256xf32, #tpu.memory_space<vmem>>, vector<8x256xf32>
    tpu.vector_store %arg5[%c0_6, %c0_7], %8 {strides = array<i32>} : memref<8x256xf32, #tpu.memory_space<vmem>>, vector<8x256xf32>,
    %c0_i32_8 = arith.constant 0 : i32
    %10 = arith.cmpi eq, %arg1, %c0_i32_8 : i32
    %11 = arith.extui %10 : i1 to i32
    %c0_i32_9 = arith.constant 0 : i32
    %12 = arith.cmpi ne, %11, %c0_i32_9 : i32
    scf.if %12 {
      %c0_10 = arith.constant 0 : index
      %c0_11 = arith.constant 0 : index
      %13 = vector.load %arg5[%c0_10, %c0_11] : memref<8x256xf32, #tpu.memory_space<vmem>>, vector<8x256xf32>
      %14 = vector.shape_cast %13 : vector<8x256xf32> to vector<1x8x256xf32>
      %cst = arith.constant dense<0.000000e+00> : vector<1xf32>
      %15 = vector.multi_reduction <add>, %14, %cst [1, 2] : vector<1x8x256xf32> to vector<1xf32>
      %16 = vector.shape_cast %15 : vector<1xf32> to vector<1x1x1xf32>
      %17 = vector.extract %16[0, 0, 0] : f32 from vector<1x1x1xf32>
      %c0_12 = arith.constant 0 : index
      %c0_13 = arith.constant 0 : index
      %18 = memref.load %arg4[%c0_12, %c0_13] : memref<1x1xf32, #tpu.memory_space<smem>>
      memref.store %17, %arg4[%c0_12, %c0_13] : memref<1x1xf32, #tpu.memory_space<smem>>
    } else {
    }
    return
  }
  func.func @transform_0(%arg0: i32, %arg1: i32) -> (i32, i32) {
    %c1_i32 = arith.constant 1 : i32
    %0 = arith.muli %arg0, %c1_i32 : i32
    %1 = arith.addi %0, %arg1 : i32
    %c0_i32 = arith.constant 0 : i32
    %c0_i32_0 = arith.constant 0 : i32
    return %1, %c0_i32 : i32, i32
  }
  func.func @transform_1(%arg0: i32, %arg1: i32) -> (i32, i32) {
    %c1_i32 = arith.constant 1 : i32
    %0 = arith.muli %arg0, %c1_i32 : i32
    %1 = arith.addi %0, %arg1 : i32
    %c0_i32 = arith.constant 0 : i32
    %c0_i32_0 = arith.constant 0 : i32
    return %1, %c0_i32 : i32, i32
  }
  func.func @transform_2(%arg0: i32, %arg1: i32) -> (i32, i32) {
    %c0_i32 = arith.constant 0 : i32
    %c0_i32_0 = arith.constant 0 : i32
    return %arg0, %c0_i32 : i32, i32
  }
}

</mosaic_0001>

<bundles_post_ra>
// kernel: tpu_custom_call.1
= control target key start
LH: loop header
LB: loop body
LE: loop exit
PB: predicated region body
PF: predicated region fallthrough
CT: control target
= control target key end

     0   :  { %7 = vsyncpa [#allocation4], 0  ;;  %s217_s0 = inlined_call_operand.hbm [shape: f32[8,256], index: 0, kind: input, shape index: {}]   ;;  %s218_s1 = inlined_call_operand.hbm [shape: f32[8,256], index: 1, kind: input, shape index: {}]   ;;  %s219_s2 = inlined_call_operand.hbm [shape: f32[1,1], index: 2, kind: output, shape index: {}]  }
   0x1   :  { %8 = vsyncpa [#allocation7], 0 }
   0x2   :  { %9 = vsyncpa [#allocation5], 0  ;;  %s163_s9 = smov [#allocation3]   ;;  %s164_s11 = smov [#allocation6]  }
   0x3   :  { %s20_s10 = sshll.u32 %s163_s9, 4  ;;  %s34_s12 = sshll.u32 %s164_s11, 4  ;;  %s21_s10 = int_to_ptr.vmem [resolvable:$true] %s20_s10  ;;  %s35_s12 = int_to_ptr.vmem [resolvable:$true] %s34_s12 }
   0x4   :  { %s103_s15 = scalar_lea.hbm %s217_s0, 256 }
   0x5   :  { %p104_p0 = scmp.ne.s32.totalorder %s217_s0, %s103_s15  ;;  %p107_p1 = scmp.lt.u32.totalorder %s103_s15, %s217_s0 }
   0x7   :  { %p109_p2 = pnand %p107_p1, %p104_p0 }
   0x9   :  { %112 = shalt.err (!%p109_p2)
}
   0xa   :  { %s113_s20 = scalar_lea.vmem %s21_s10, 256  ;;  %p118_p4 = scmp.lt.s32.totalorder %s21_s10, %s21_s10 }
   0xb   :  { %p114_p3 = scmp.ne.s32.totalorder %s21_s10, %s113_s20  ;;  %p119_p5 = scmp.lt.s32.totalorder %s113_s20, %s113_s20 }
   0xd   :  { %p120_p6 = por %p119_p5, %p118_p4 }
   0xf   :  { %p121_p7 = pnand %p120_p6, %p114_p3 }
  0x11   :  { %124 = shalt.err (!%p121_p7)
}
  0x12   :  { %23 = dma.hbm_to_vmem [thread:$0]  %s217_s0, 256, %s21_s10, [#allocation4]  }
  0x13   :  { %s125_s25 = scalar_lea.hbm %s218_s1, 256 }
  0x14   :  { %p126_p8 = scmp.ne.s32.totalorder %s218_s1, %s125_s25  ;;  %p129_p9 = scmp.lt.u32.totalorder %s125_s25, %s218_s1 }
  0x16   :  { %p131_p10 = pnand %p129_p9, %p126_p8 }
  0x18   :  { %134 = shalt.err (!%p131_p10)
}
  0x19   :  { %s135_s30 = scalar_lea.vmem %s35_s12, 256  ;;  %p140_p12 = scmp.lt.s32.totalorder %s35_s12, %s35_s12 }
  0x1a   :  { %p136_p11 = scmp.ne.s32.totalorder %s35_s12, %s135_s30  ;;  %p141_p13 = scmp.lt.s32.totalorder %s135_s30, %s135_s30 }
  0x1c   :  { %p142_p0 = por %p141_p13, %p140_p12 }
  0x1e   :  { %p143_p1 = pnand %p142_p0, %p136_p11 }
  0x20   :  { %146 = shalt.err (!%p143_p1)
}
  0x21   :  { %37 = dma.hbm_to_vmem [thread:$0]  %s218_s1, 256, %s35_s12, [#allocation7]  }
  0x22   :  { %157 = dma.done.wait [#allocation4], 256  }
  0x23   :  { %158 = vsyncadd [#allocation4], 4294967040 }
  0x24   :  { %159 = dma.done.wait [#allocation7], 256  }
  0x25   :  { %160 = vsyncadd [#allocation7], 4294967040  ;;  %v52_v0 = vld [vmem:[#allocation3] sm:$0xff]  ;;  %v53_v1 = vld [vmem:[#allocation3 + $0x8] sm:$0xff]  ;;  %s147_s6 = scalar_lea.hbm %s219_s2, 16 }
  0x26   :  { %v54_v2 = vld [vmem:[#allocation6] sm:$0xff]  ;;  %v55_v3 = vld [vmem:[#allocation6 + $0x8] sm:$0xff]  ;;  %p148_p2 = scmp.ne.s32.totalorder %s219_s2, %s147_s6  ;;  %p151_p3 = scmp.lt.u32.totalorder %s147_s6, %s219_s2 }
  0x27   :  { %v56_v4 = vsub.f32 %v52_v0, %v54_v2  ;;  %v57_v5 = vsub.f32 %v53_v1, %v55_v3 }
  0x28   :  { %p153_p4 = pnand %p151_p3, %p148_p2 }
  0x29   :  { %v58_v6 = vmul.f32 %v56_v4, %v56_v4  ;;  %v59_v7 = vmul.f32 %v57_v5, %v57_v5 }
  0x2b   :  { %v71_v8 = vadd.f32 %v59_v7, %v58_v6 }
  0x2d   :  { %72 = vadd.xlane.f32.xlu0 %v71_v8 }
  0xba   :  { %v73_v9 = vpop.xlane.xlu0 %72 }
  0xbb   :  { %v74_v10 = vrot.slane %v73_v9, 4 }
  0xbd   :  { %v75_v11 = vadd.f32 %v74_v10, %v73_v9 }
  0xbf   :  { %v76_v12 = vrot.slane %v75_v11, 2 }
  0xc1   :  { %v77_v13 = vadd.f32 %v76_v12, %v75_v11 }
  0xc3   :  { %v78_v14 = vrot.slane %v77_v13, 1 }
  0xc5   :  { %v79_v15 = vadd.f32 %v78_v14, %v77_v13 }
  0xc7   :  { %98 = vpush %v79_v15 }
  0xf8   :  { %s99_s1 = spop %98 }
  0xf9   :  { %82 = sst [smem:[#allocation8]] %s99_s1 }
  0xfa   :  { %156 = shalt.err (!%p153_p4)
}
  0xfb   :  { %s165_s11 = smov [#allocation8]  }
  0xfc   :  { %90 = dma.smem_to_hbm %s165_s11, 16, %s219_s2, [#allocation5]  }
  0xfd   :  { %161 = dma.done.wait [#allocation5], 16  }
  0xfe   :  { %162 = vsyncadd [#allocation5], 4294967280 }
  0xff   :  { %94 = sfence }
 0x100   :  { %95 = vsyncpa [#allocation4], 1 }
 0x101   :  { %96 = vsyncpa [#allocation7], 1 }
 0x102   :  { %97 = vsyncpa [#allocation5], 1 }

</bundles_post_ra>
